<compile_context>
chip_gen: v7x
topology: tpu7x:2x2x1
jax: 0.10.0
libtpu: 0.0.40
codegen_flags: <defaults>
</compile_context>

<pallas_src>
import jax
import jax.numpy as jnp
from jax.experimental import pallas as pl
from jax.experimental.pallas import tpu as pltpu

_LANE = 128
_TARGET_TILE_BYTES = 4 * 1024 * 1024   # ~4 MiB/tile; 4 buffers -> 16 MiB VMEM
_VMEM_LIMIT_BYTES = 48 * 1024 * 1024   # explicit scoped-VMEM limit (safe on v5e/v6e/v7x)
_MIN_SPLIT_BYTES = 1 * 1024 * 1024     # force >=2 grid steps above this size (v7x megacore)


def _copy_kernel(x_ref, o_ref):
    # Identical in/out block shapes: pure copy, no layout work.
    o_ref[...] = x_ref[...]


def _sublane_quantum(dtype) -> int:
    # Packed-sublane tile height: 8 rows (f32/4B), 16 (bf16/2B), 32 (int8/1B).
    itemsize = jnp.dtype(dtype).itemsize
    return max(8, 8 * (4 // max(1, itemsize)))


def _pick_cols(total: int):
    """Largest lane-dense column count (multiple of 128) dividing `total`."""
    for cand in (4096, 2048, 1024, 512, 256, 128):
        if total % cand == 0:
            return cand
    return None


def _round_up(x: int, m: int) -> int:
    return ((x + m - 1) // m) * m


def _round_down(x: int, m: int) -> int:
    return (x // m) * m


def _identity_copy_2d(x2d, rows: int, cols: int, dtype):
    sub = _sublane_quantum(dtype)
    dtype_bytes = jnp.dtype(dtype).itemsize
    row_bytes = cols * dtype_bytes

    row_tile = max(sub, _round_down(_TARGET_TILE_BYTES // row_bytes, sub))
    if row_tile >= rows:
        if rows * row_bytes > _MIN_SPLIT_BYTES and rows > sub:
            # Big enough to matter: split in two so both v7x TensorCores share it.
            row_tile = max(sub, _round_up(pl.cdiv(rows, 2), sub))
        else:
            row_tile = rows  # single full-extent block (always legal)

    grid = pl.cdiv(rows, row_tile)  # partial last block handled by Pallas
    return pl.pallas_call(
        _copy_kernel,
        out_shape=jax.ShapeDtypeStruct((rows, cols), dtype),
        grid_spec=pltpu.PrefetchScalarGridSpec(
            num_scalar_prefetch=0,
            grid=(grid,),
            in_specs=[pl.BlockSpec((row_tile, cols), lambda i: (i, 0))],
            out_specs=pl.BlockSpec((row_tile, cols), lambda i: (i, 0)),
        ),
        input_output_aliases={0: 0},
        compiler_params=pltpu.CompilerParams(
            dimension_semantics=("parallel",),
            vmem_limit_bytes=_VMEM_LIMIT_BYTES,
        ),
    )(x2d)


def _identity_copy_1d(x_flat, total: int, dtype):
    # Robust fallback for element counts not divisible by 128.
    dtype_bytes = jnp.dtype(dtype).itemsize
    quantum = _sublane_quantum(dtype) * _LANE
    chunk = max(quantum, _round_down(_TARGET_TILE_BYTES // dtype_bytes, quantum))
    if chunk >= total:
        chunk = total  # single full-extent block
    grid = pl.cdiv(total, chunk)
    return pl.pallas_call(
        _copy_kernel,
        out_shape=jax.ShapeDtypeStruct((total,), dtype),
        grid_spec=pltpu.PrefetchScalarGridSpec(
            num_scalar_prefetch=0,
            grid=(grid,),
            in_specs=[pl.BlockSpec((chunk,), lambda i: (i,))],
            out_specs=pl.BlockSpec((chunk,), lambda i: (i,)),
        ),
        input_output_aliases={0: 0},
        compiler_params=pltpu.CompilerParams(
            dimension_semantics=("parallel",),
            vmem_limit_bytes=_VMEM_LIMIT_BYTES,
        ),
    )(x_flat)


def pixel_shuffle(x: jnp.ndarray, upscale_factor: int) -> jnp.ndarray:
    """Pallas implementation of the module's forward: x.view(n, C//r, W*r).

    x: (N, C, W) with C divisible by upscale_factor.
    returns: (N, C // upscale_factor, W * upscale_factor)
    """
    n, c, w = x.shape
    assert c % upscale_factor == 0, "channels must be divisible by upscale_factor"
    c_out = c // upscale_factor
    w_new = w * upscale_factor
    total = n * c * w

    # All reshapes below are metadata-only on a contiguous row-major tensor;
    # the kernel is an aliased identity copy of a lane-dense flattening.
    cols = _pick_cols(total)
    if cols is None:
        out_flat = _identity_copy_1d(x.reshape(total), total, x.dtype)
        return out_flat.reshape(n, c_out, w_new)

    rows = total // cols
    out2d = _identity_copy_2d(x.reshape(rows, cols), rows, cols, x.dtype)
    return out2d.reshape(n, c_out, w_new)


if __name__ == "__main__":
    key = jax.random.PRNGKey(0)

    # Small shape consistent with the module's forward: (N, C, W) 3-D input.
    N, C, W = 2, 4, 16
    r = 2
    x = jax.random.normal(key, (N, C, W), dtype=jnp.float32)
    ref = jnp.reshape(x, (N, C // r, W * r))  # module == row-major view
    out = jax.block_until_ready(pixel_shuffle(x, r))
    assert out.shape == (N, C // r, W * r), out.shape
    assert out.dtype == x.dtype
    assert jnp.array_equal(out, ref), "mismatch vs reshape reference (small)"

    # Medium shape (~2.25 MiB) exercising the tiled, 2-step parallel path.
    N2, C2, W2 = 4, 96, 1536
    x2 = jax.random.normal(jax.random.PRNGKey(1), (N2, C2, W2), dtype=jnp.float32)
    ref2 = jnp.reshape(x2, (N2, C2 // r, W2 * r))
    out2 = jax.block_until_ready(pixel_shuffle(x2, r))
    assert out2.shape == (N2, C2 // r, W2 * r), out2.shape
    assert jnp.array_equal(out2, ref2), "mismatch vs reshape reference (medium)"

    print("KERNEL_OK")
</pallas_src>

<mosaic_0001>
module attributes {stable_mosaic.version = 11 : i64} {
  func.func @_copy_kernel(%arg0: i32, %arg1: memref<1x128xf32, #tpu.memory_space<vmem>>, %arg2: memref<1x128xf32, #tpu.memory_space<vmem>>) attributes {dimension_semantics = [#tpu.dimension_semantics<parallel>], iteration_bounds = array<i64: 1>, scalar_prefetch = 0 : i64, scratch_operands = 0 : i64, tpu.core_type = #tpu.core_type<tc>, window_params = [{transform_indices = @transform_0, window_bounds = array<i64: 1, 128>}, {transform_indices = @transform_1, window_bounds = array<i64: 1, 128>}]} {
    %c0 = arith.constant 0 : index
    %c0_0 = arith.constant 0 : index
    %0 = vector.load %arg1[%c0, %c0_0] : memref<1x128xf32, #tpu.memory_space<vmem>>, vector<1x128xf32>
    %c0_1 = arith.constant 0 : index
    %c0_2 = arith.constant 0 : index
    %1 = vector.load %arg2[%c0_1, %c0_2] : memref<1x128xf32, #tpu.memory_space<vmem>>, vector<1x128xf32>
    tpu.vector_store %arg2[%c0_1, %c0_2], %0 {strides = array<i32>} : memref<1x128xf32, #tpu.memory_space<vmem>>, vector<1x128xf32>,
    return
  }
  func.func @transform_0(%arg0: i32) -> (i32, i32) {
    %c0_i32 = arith.constant 0 : i32
    %c0_i32_0 = arith.constant 0 : i32
    return %arg0, %c0_i32 : i32, i32
  }
  func.func @transform_1(%arg0: i32) -> (i32, i32) {
    %c0_i32 = arith.constant 0 : i32
    %c0_i32_0 = arith.constant 0 : i32
    return %arg0, %c0_i32 : i32, i32
  }
}

</mosaic_0001>

<bundles_post_ra>
// kernel: tpu_custom_call.1
= control target key start
LH: loop header
LB: loop body
LE: loop exit
PB: predicated region body
PF: predicated region fallthrough
CT: control target
= control target key end

     0   :  { %6 = vsyncpa [#allocation3], 0  ;;  %s124_s0 = inlined_call_operand.hbm [shape: f32[1,128], index: 0, kind: input, shape index: {}, may-alias: {0,1}]   ;;  %s125_s1 = inlined_call_operand.hbm [shape: f32[1,128], index: 1, kind: output, shape index: {}, may-alias: {0,1}]  }
   0x1   :  { %7 = vsyncpa [#allocation4], 0  ;;  %s88_s6 = smov [#allocation2]   ;;  %s40_s10 = scalar_lea.hbm %s124_s0, 16 }
   0x2   :  { %s14_s7 = sshll.u32 %s88_s6, 4  ;;  %p41_p0 = scmp.ne.s32.totalorder %s124_s0, %s40_s10  ;;  %s15_s7 = int_to_ptr.vmem [resolvable:$true] %s14_s7 }
   0x3   :  { %p44_p1 = scmp.lt.u32.totalorder %s40_s10, %s124_s0 }
   0x5   :  { %p46_p2 = pnand %p44_p1, %p41_p0 }
   0x7   :  { %49 = shalt.err (!%p46_p2)
}
   0x8   :  { %s50_s15 = scalar_lea.vmem %s15_s7, 16  ;;  %s54_s16 = scalar_lea.vmem %s15_s7, 32 }
   0x9   :  { %p51_p3 = scmp.ne.s32.totalorder %s15_s7, %s50_s15  ;;  %p55_p4 = scmp.lt.s32.totalorder %s15_s7, %s15_s7 }
   0xa   :  { %p56_p5 = scmp.lt.s32.totalorder %s54_s16, %s50_s15 }
   0xc   :  { %p57_p6 = por %p56_p5, %p55_p4 }
   0xe   :  { %p58_p7 = pnand %p57_p6, %p51_p3 }
  0x10   :  { %61 = shalt.err (!%p58_p7)
}
  0x11   :  { %17 = dma.hbm_to_vmem [thread:$0]  %s124_s0, 16, %s15_s7, [#allocation3]  }
  0x12   :  { %84 = dma.done.wait [#allocation3], 16  }
  0x13   :  { %85 = vsyncadd [#allocation3], 4294967280  ;;  %s89_s19 = smov [#allocation5]   ;;  %v21_v0 = vld [vmem:[#allocation2] sm:$0x1] }
  0x14   :  { %s29_s20 = sshll.u32 %s89_s19, 4  ;;  %22 = vst [vmem:[#allocation5] sm:$0x1] %v21_v0  ;;  %s30_s20 = int_to_ptr.vmem [resolvable:$true] %s29_s20 }
  0x15   :  { %s62_s21 = scalar_lea.vmem %s30_s20, 16  ;;  %s66_s22 = scalar_lea.vmem %s30_s20, 32 }
  0x16   :  { %p63_p8 = scmp.ne.s32.totalorder %s30_s20, %s62_s21  ;;  %p67_p9 = scmp.lt.s32.totalorder %s30_s20, %s30_s20 }
  0x17   :  { %p68_p10 = scmp.lt.s32.totalorder %s66_s22, %s62_s21 }
  0x19   :  { %p69_p11 = por %p68_p10, %p67_p9 }
  0x1b   :  { %p70_p12 = pnand %p69_p11, %p63_p8 }
  0x1d   :  { %73 = shalt.err (!%p70_p12)
}
  0x1e   :  { %s74_s25 = scalar_lea.hbm %s125_s1, 16 }
  0x1f   :  { %p75_p13 = scmp.ne.s32.totalorder %s125_s1, %s74_s25  ;;  %p78_p0 = scmp.lt.u32.totalorder %s74_s25, %s125_s1 }
  0x21   :  { %p80_p1 = pnand %p78_p0, %p75_p13 }
  0x23   :  { %83 = shalt.err (!%p80_p1)
}
  0x24   :  { %32 = dma.vmem_to_hbm [thread:$0]  %s30_s20, 16, %s125_s1, [#allocation4]  }
  0x25   :  { %86 = dma.done.wait [#allocation4], 16  }
  0x26   :  { %87 = vsyncadd [#allocation4], 4294967280 }
  0x27   :  { %36 = vsyncpa [#allocation3], 1 }
  0x28   :  { %37 = vsyncpa [#allocation4], 1 }

</bundles_post_ra>
